<compile_context>
chip_gen: v7x
topology: tpu7x:2x2x1
jax: 0.10.0
libtpu: 0.0.40
codegen_flags: <defaults>
</compile_context>

<pallas_src>
import functools

import jax
import jax.numpy as jnp
from jax.experimental import pallas as pl
from jax.experimental.pallas import tpu as pltpu


def _round_up(a, b):
    return (a + b - 1) // b * b


def _vmem_budget_bytes():
    """~75% of physical VMEM: ~96 MiB on v5e/v6e (128 MiB parts), ~48 MiB on v7x."""
    cap = 64 * 1024 * 1024
    try:
        cap = int(getattr(pltpu.get_tpu_info(), "vmem_capacity_bytes", cap))
    except Exception:
        pass
    return (cap * 3) // 4


def _pick_row_tile(n_rows, fixed_bytes, per_row_bytes, budget):
    """Largest row tile (multiple of 8 that divides n_rows) fitting the VMEM
    budget, while leaving >= 2 grid steps when possible (v7x megacore)."""
    avail = max(budget - fixed_bytes, 2 * 1024 * 1024)
    max_rows = max(8, int(avail // max(per_row_bytes, 1)))
    max_rows = min(max_rows, 1024)
    if n_rows >= 16:
        max_rows = min(max_rows, n_rows // 2)
    units = n_rows // 8
    cap = max(1, max_rows // 8)
    best = 1
    for d in range(min(units, cap), 0, -1):
        if units % d == 0:
            best = d
            break
    return best * 8


def _erf_poly(x):
    """Abramowitz & Stegun 7.1.26 rational erf approximation (|err| < 1.5e-7)."""
    a1, a2, a3, a4, a5 = (0.254829592, -0.284496736, 1.421413741,
                          -1.453152027, 1.061405429)
    p = 0.3275911
    sgn = jnp.where(x >= 0.0, 1.0, -1.0)
    z = jnp.abs(x)
    t = 1.0 / (1.0 + p * z)
    poly = ((((a5 * t + a4) * t + a3) * t + a2) * t + a1) * t
    return sgn * (1.0 - poly * jnp.exp(-z * z))


def _gelu_exact(x):
    # torch nn.GELU() default (exact erf) via a VPU-friendly polynomial.
    return 0.5 * x * (1.0 + _erf_poly(x * 0.7071067811865476))


def _layernorm_tail(z, g, bt, true_e, eps):
    """LayerNorm over the last dim; columns >= true_e are excluded from the
    stats and zeroed (gamma/beta are zero-padded there too)."""
    e_pad = z.shape[-1]
    if true_e == e_pad:                       # lane-aligned: no masking needed
        mean = jnp.mean(z, axis=-1, keepdims=True)
        centered = z - mean
        var = jnp.mean(centered * centered, axis=-1, keepdims=True)
    else:
        inv_e = 1.0 / float(true_e)
        valid = jax.lax.broadcasted_iota(jnp.int32, (1, e_pad), 1) < true_e
        mean = jnp.sum(jnp.where(valid, z, 0.0), axis=-1, keepdims=True) * inv_e
        centered = jnp.where(valid, z - mean, 0.0)
        var = jnp.sum(centered * centered, axis=-1, keepdims=True) * inv_e
    return centered * jax.lax.rsqrt(var + eps) * g + bt


# --------------------------------------------------------------------------
# Kernel bodies
# --------------------------------------------------------------------------
def _matmul_bias_kernel(x_ref, w_ref, b_ref, o_ref):
    acc = jnp.dot(x_ref[...], w_ref[...], preferred_element_type=jnp.float32)
    o_ref[...] = (acc + b_ref[...]).astype(o_ref.dtype)


def _flash_attn_kernel(*refs, scale, has_mask):
    if has_mask:
        q_ref, k_ref, v_ref, mask_ref, o_ref, m_sc, l_sc, acc_sc = refs
    else:
        q_ref, k_ref, v_ref, o_ref, m_sc, l_sc, acc_sc = refs
    ki = pl.program_id(3)

    @pl.when(ki == 0)
    def _():
        m_sc[...] = jnp.full_like(m_sc, -jnp.inf)
        l_sc[...] = jnp.zeros_like(l_sc)
        acc_sc[...] = jnp.zeros_like(acc_sc)

    # Q/K stay in the activation dtype; accumulate in f32 on the MXU.
    s = jax.lax.dot_general(q_ref[...], k_ref[...], (((1,), (1,)), ((), ())),
                            preferred_element_type=jnp.float32) * scale
    if has_mask:
        s = s + mask_ref[...]

    m_prev = m_sc[...]
    m_new = jnp.maximum(m_prev, jnp.max(s, axis=-1, keepdims=True))
    alpha = jnp.exp(m_prev - m_new)
    p = jnp.exp(s - m_new)
    l_sc[...] = alpha * l_sc[...] + jnp.sum(p, axis=-1, keepdims=True)
    acc_sc[...] = alpha * acc_sc[...] + jnp.dot(
        p.astype(v_ref.dtype), v_ref[...], preferred_element_type=jnp.float32)
    m_sc[...] = m_new

    @pl.when(ki == pl.num_programs(3) - 1)
    def _():
        # Deferred softmax normalization: EUP reciprocal + one NR refinement.
        l = l_sc[...]
        r = pl.reciprocal(l, approx=True)
        r = r * (2.0 - l * r)
        o_ref[...] = (acc_sc[...] * r).astype(o_ref.dtype)


def _proj_addnorm_kernel(a_ref, x_ref, w_ref, b_ref, g_ref, bt_ref, o_ref, *,
                         true_e, eps):
    y = jnp.dot(a_ref[...], w_ref[...],
                preferred_element_type=jnp.float32) + b_ref[...]
    # TODO(synk): dropout omitted (eval-mode identity).
    z = x_ref[...].astype(jnp.float32) + y
    o_ref[...] = _layernorm_tail(z, g_ref[...], bt_ref[...],
                                 true_e, eps).astype(o_ref.dtype)


def _ffn_addnorm_kernel(x_ref, w1_ref, b1_ref, w2_ref, b2_ref, g_ref, bt_ref,
                        o_ref, *, true_e, eps):
    x = x_ref[...]
    h = jnp.dot(x, w1_ref[...], preferred_element_type=jnp.float32) + b1_ref[...]
    h = _gelu_exact(h)
    y = jnp.dot(h.astype(w2_ref.dtype), w2_ref[...],
                preferred_element_type=jnp.float32) + b2_ref[...]
    # TODO(synk): dropout omitted (eval-mode identity).
    z = x.astype(jnp.float32) + y
    o_ref[...] = _layernorm_tail(z, g_ref[...], bt_ref[...],
                                 true_e, eps).astype(o_ref.dtype)


# --------------------------------------------------------------------------
# Pallas-call wrappers
# --------------------------------------------------------------------------
def _matmul_bias(x2, w, b, *, budget):
    n, kdim = x2.shape
    mdim = w.shape[1]
    act = jnp.dtype(x2.dtype).itemsize
    wbytes = 2 * w.size * jnp.dtype(w.dtype).itemsize      # double-buffered
    per_row = 2 * (kdim + mdim) * act + mdim * 4
    tm = _pick_row_tile(n, wbytes, per_row, budget)
    return pl.pallas_call(
        _matmul_bias_kernel,
        out_shape=jax.ShapeDtypeStruct((n, mdim), x2.dtype),
        grid=(n // tm,),
        in_specs=[
            pl.BlockSpec((tm, kdim), lambda i: (i, 0)),
            pl.BlockSpec((kdim, mdim), lambda i: (0, 0)),
            pl.BlockSpec((1, mdim), lambda i: (0, 0)),
        ],
        out_specs=pl.BlockSpec((tm, mdim), lambda i: (i, 0)),
        compiler_params=pltpu.CompilerParams(
            dimension_semantics=("parallel",),
            vmem_limit_bytes=budget),
    )(x2, w, b)


def _flash_attention(qkv, mask_p, *, n_heads, dh_pad, true_dh, budget):
    B, S_pad, _ = qkv.shape
    Hd_pad = n_heads * dh_pad
    tq = tk = min(S_pad, 256)
    assert S_pad % tq == 0
    scale = float(true_dh) ** -0.5
    has_mask = mask_p is not None
    kernel = functools.partial(_flash_attn_kernel, scale=scale,
                               has_mask=has_mask)

    in_specs = [
        pl.BlockSpec((None, tq, dh_pad), lambda b, h, qi, ki: (b, qi, h)),
        pl.BlockSpec((None, tk, dh_pad),
                     lambda b, h, qi, ki: (b, ki, n_heads + h)),
        pl.BlockSpec((None, tk, dh_pad),
                     lambda b, h, qi, ki: (b, ki, 2 * n_heads + h)),
    ]
    args = [qkv, qkv, qkv]
    if has_mask:
        in_specs.append(pl.BlockSpec((tq, tk), lambda b, h, qi, ki: (qi, ki)))
        args.append(mask_p)

    return pl.pallas_call(
        kernel,
        out_shape=jax.ShapeDtypeStruct((B, S_pad, Hd_pad), qkv.dtype),
        grid=(B, n_heads, S_pad // tq, S_pad // tk),
        in_specs=in_specs,
        out_specs=pl.BlockSpec((None, tq, dh_pad),
                               lambda b, h, qi, ki: (b, qi, h)),
        scratch_shapes=[
            pltpu.VMEM((tq, 1), jnp.float32),
            pltpu.VMEM((tq, 1), jnp.float32),
            pltpu.VMEM((tq, dh_pad), jnp.float32),
        ],
        compiler_params=pltpu.CompilerParams(
            dimension_semantics=("parallel", "parallel", "parallel",
                                 "arbitrary"),
            vmem_limit_bytes=budget),
    )(*args)


def _proj_addnorm(attn2, x2, wo_p, bo_p, g_p, bt_p, *, true_e, eps, budget):
    n, hd = attn2.shape
    e_pad = x2.shape[1]
    act = jnp.dtype(x2.dtype).itemsize
    wbytes = 2 * wo_p.size * jnp.dtype(wo_p.dtype).itemsize
    per_row = 2 * (hd + 2 * e_pad) * act + 8 * e_pad * 4
    tm = _pick_row_tile(n, wbytes, per_row, budget)
    kernel = functools.partial(_proj_addnorm_kernel, true_e=true_e, eps=eps)
    return pl.pallas_call(
        kernel,
        out_shape=jax.ShapeDtypeStruct((n, e_pad), x2.dtype),
        grid=(n // tm,),
        in_specs=[
            pl.BlockSpec((tm, hd), lambda i: (i, 0)),
            pl.BlockSpec((tm, e_pad), lambda i: (i, 0)),
            pl.BlockSpec((hd, e_pad), lambda i: (0, 0)),
            pl.BlockSpec((1, e_pad), lambda i: (0, 0)),
            pl.BlockSpec((1, e_pad), lambda i: (0, 0)),
            pl.BlockSpec((1, e_pad), lambda i: (0, 0)),
        ],
        out_specs=pl.BlockSpec((tm, e_pad), lambda i: (i, 0)),
        compiler_params=pltpu.CompilerParams(
            dimension_semantics=("parallel",),
            vmem_limit_bytes=budget),
    )(attn2, x2, wo_p, bo_p, g_p, bt_p)


def _ffn_addnorm(x2, w1_p, b1_p, w2_p, b2_p, g_p, bt_p, *, true_e, eps, budget):
    n, e_pad = x2.shape
    f_pad = w1_p.shape[1]
    act = jnp.dtype(x2.dtype).itemsize
    wbytes = 2 * (w1_p.size * jnp.dtype(w1_p.dtype).itemsize
                  + w2_p.size * jnp.dtype(w2_p.dtype).itemsize)
    # Includes f32 GELU temporaries on the (tm, F_pad) intermediate.
    per_row = 2 * 2 * e_pad * act + 3 * f_pad * 4 + 8 * e_pad * 4
    tm = _pick_row_tile(n, wbytes, per_row, budget)
    kernel = functools.partial(_ffn_addnorm_kernel, true_e=true_e, eps=eps)
    return pl.pallas_call(
        kernel,
        out_shape=jax.ShapeDtypeStruct((n, e_pad), x2.dtype),
        grid=(n // tm,),
        in_specs=[
            pl.BlockSpec((tm, e_pad), lambda i: (i, 0)),
            pl.BlockSpec((e_pad, f_pad), lambda i: (0, 0)),
            pl.BlockSpec((1, f_pad), lambda i: (0, 0)),
            pl.BlockSpec((f_pad, e_pad), lambda i: (0, 0)),
            pl.BlockSpec((1, e_pad), lambda i: (0, 0)),
            pl.BlockSpec((1, e_pad), lambda i: (0, 0)),
            pl.BlockSpec((1, e_pad), lambda i: (0, 0)),
        ],
        out_specs=pl.BlockSpec((tm, e_pad), lambda i: (i, 0)),
        compiler_params=pltpu.CompilerParams(
            dimension_semantics=("parallel",),
            vmem_limit_bytes=budget),
    )(x2, w1_p, b1_p, w2_p, b2_p, g_p, bt_p)


# --------------------------------------------------------------------------
# Weight preparation (padding + per-head column layout)
# --------------------------------------------------------------------------
def _prep_layer(p, E, E_pad, H, dh, dh_pad, F, F_pad):
    Hd_pad = H * dh_pad
    w_in, b_in = p["w_in"], p["b_in"]
    parts_w, parts_b = [], []
    for idx in range(3):                       # q, k, v
        w = w_in[:, idx * E:(idx + 1) * E].reshape(E, H, dh)
        w = jnp.pad(w, ((0, E_pad - E), (0, 0), (0, dh_pad - dh)))
        parts_w.append(w.reshape(E_pad, Hd_pad))
        b = b_in[idx * E:(idx + 1) * E].reshape(H, dh)
        b = jnp.pad(b, ((0, 0), (0, dh_pad - dh)))
        parts_b.append(b.reshape(Hd_pad))
    w_qkv = jnp.concatenate(parts_w, axis=1)                      # (E_pad, 3*Hd_pad)
    b_qkv = jnp.concatenate(parts_b).astype(jnp.float32).reshape(1, 3 * Hd_pad)

    wo = p["wo"].reshape(H, dh, E)
    wo = jnp.pad(wo, ((0, 0), (0, dh_pad - dh), (0, E_pad - E)))
    wo = wo.reshape(Hd_pad, E_pad)

    def vec(v):
        return jnp.pad(v.astype(jnp.float32), (0, E_pad - E)).reshape(1, E_pad)

    w1 = jnp.pad(p["w1"], ((0, E_pad - E), (0, F_pad - F)))
    w2 = jnp.pad(p["w2"], ((0, F_pad - F), (0, E_pad - E)))
    b1 = jnp.pad(p["b1"].astype(jnp.float32), (0, F_pad - F)).reshape(1, F_pad)

    return dict(w_qkv=w_qkv, b_qkv=b_qkv, wo=wo, bo=vec(p["bo"]),
                ln1_g=vec(p["ln1_g"]), ln1_b=vec(p["ln1_b"]),
                w1=w1, b1=b1, w2=w2, b2=vec(p["b2"]),
                ln2_g=vec(p["ln2_g"]), ln2_b=vec(p["ln2_b"]))


# --------------------------------------------------------------------------
# Encoder forward
# --------------------------------------------------------------------------
def encoder_forward(x, layers, mask=None, *, eps=1e-5):
    """Pallas forward of Encoder: n_blocks x (MHA+AddNorm, FFN+AddNorm)."""
    B, S, E = x.shape
    H = layers[0]["n_heads"]
    assert E % H == 0
    dh = E // H
    dh_pad = _round_up(dh, 128)
    E_pad = _round_up(E, 128)
    F = layers[0]["w1"].shape[1]
    F_pad = _round_up(F, 128)
    seq_tile = 256 if S >= 256 else _round_up(S, 8)
    S_pad = _round_up(S, seq_tile)
    budget = _vmem_budget_bytes()

    # Additive attention mask (torch semantics); padded key columns are always
    # masked.  mask=None with no sequence padding -> mask-free kernel.
    # TODO(synk): only 2-D (S, S) attn_mask supported (no per-batch/head masks).
    mask_p = None
    if mask is not None or S_pad != S:
        if mask is None:
            m = jnp.zeros((S, S), jnp.float32)
        elif mask.dtype == jnp.bool_:
            m = jnp.where(mask, -1e30, 0.0).astype(jnp.float32)
        else:
            m = mask.astype(jnp.float32)
        m = jnp.pad(m, ((0, S_pad - S), (0, S_pad - S)))
        if S_pad != S:
            key_valid = jnp.arange(S_pad) < S
            m = jnp.where(key_valid[None, :], m, -1e30)
        mask_p = m

    # Pad activations once and stay padded for all layers.
    xp = jnp.pad(x, ((0, 0), (0, S_pad - S), (0, E_pad - E)))
    N = B * S_pad
    Hd_pad = H * dh_pad

    for p in layers:
        w = _prep_layer(p, E, E_pad, H, dh, dh_pad, F, F_pad)
        x2 = xp.reshape(N, E_pad)
        qkv2 = _matmul_bias(x2, w["w_qkv"], w["b_qkv"], budget=budget)
        qkv = qkv2.reshape(B, S_pad, 3 * Hd_pad)
        attn = _flash_attention(qkv, mask_p, n_heads=H, dh_pad=dh_pad,
                                true_dh=dh, budget=budget)
        x1 = _proj_addnorm(attn.reshape(N, Hd_pad), x2, w["wo"], w["bo"],
                           w["ln1_g"], w["ln1_b"], true_e=E, eps=eps,
                           budget=budget)
        xp = _ffn_addnorm(x1, w["w1"], w["b1"], w["w2"], w["b2"],
                          w["ln2_g"], w["ln2_b"], true_e=E, eps=eps,
                          budget=budget).reshape(B, S_pad, E_pad)

    return xp[:, :S, :E]


# --------------------------------------------------------------------------
# Pure-JAX reference (mirrors torch eval-mode semantics)
# --------------------------------------------------------------------------
def _layernorm_ref(z, g, b, eps):
    mean = jnp.mean(z, axis=-1, keepdims=True)
    var = jnp.mean((z - mean) ** 2, axis=-1, keepdims=True)
    return (z - mean) * jax.lax.rsqrt(var + eps) * g + b


def _ref_encoder(x, layers, mask=None, eps=1e-5):
    hp = jax.lax.Precision.HIGHEST
    B, S, E = x.shape
    for p in layers:
        H = p["n_heads"]
        dh = E // H
        qkv = jnp.einsum("bse,ef->bsf", x, p["w_in"], precision=hp) + p["b_in"]
        q, k, v = jnp.split(qkv, 3, axis=-1)
        q = q.reshape(B, S, H, dh).transpose(0, 2, 1, 3)
        k = k.reshape(B, S, H, dh).transpose(0, 2, 1, 3)
        v = v.reshape(B, S, H, dh).transpose(0, 2, 1, 3)
        scores = jnp.einsum("bhqd,bhkd->bhqk", q, k, precision=hp) / (dh ** 0.5)
        if mask is not None:
            scores = scores + mask
        pr = jax.nn.softmax(scores, axis=-1)
        attn = jnp.einsum("bhqk,bhkd->bhqd", pr, v, precision=hp)
        attn = attn.transpose(0, 2, 1, 3).reshape(B, S, E)
        attn = jnp.einsum("bse,ef->bsf", attn, p["wo"], precision=hp) + p["bo"]
        x = _layernorm_ref(x + attn, p["ln1_g"], p["ln1_b"], eps)
        h = jax.nn.gelu(jnp.einsum("bse,ef->bsf", x, p["w1"], precision=hp)
                        + p["b1"], approximate=False)
        y = jnp.einsum("bsf,fe->bse", h, p["w2"], precision=hp) + p["b2"]
        x = _layernorm_ref(x + y, p["ln2_g"], p["ln2_b"], eps)
    return x


if __name__ == "__main__":
    # Small shapes consistent with the module: tokens [B, S, E], H heads, FFN F.
    B, S, E, H, F, n_blocks = 2, 8, 32, 4, 64, 2

    key = jax.random.PRNGKey(0)
    key, kx = jax.random.split(key)
    x = jax.random.normal(kx, (B, S, E), dtype=jnp.float32)

    layers = []
    for _ in range(n_blocks):
        key, *ks = jax.random.split(key, 13)
        layers.append(dict(
            n_heads=H,
            w_in=jax.random.normal(ks[0], (E, 3 * E), jnp.float32) * (E ** -0.5),
            b_in=jax.random.normal(ks[1], (3 * E,), jnp.float32) * 0.02,
            wo=jax.random.normal(ks[2], (E, E), jnp.float32) * (E ** -0.5),
            bo=jax.random.normal(ks[3], (E,), jnp.float32) * 0.02,
            ln1_g=1.0 + 0.1 * jax.random.normal(ks[4], (E,), jnp.float32),
            ln1_b=0.02 * jax.random.normal(ks[5], (E,), jnp.float32),
            w1=jax.random.normal(ks[6], (E, F), jnp.float32) * (E ** -0.5),
            b1=jax.random.normal(ks[7], (F,), jnp.float32) * 0.02,
            w2=jax.random.normal(ks[8], (F, E), jnp.float32) * (F ** -0.5),
            b2=jax.random.normal(ks[9], (E,), jnp.float32) * 0.02,
            ln2_g=1.0 + 0.1 * jax.random.normal(ks[10], (E,), jnp.float32),
            ln2_b=0.02 * jax.random.normal(ks[11], (E,), jnp.float32),
        ))

    out = encoder_forward(x, layers, mask=None)
    out = jax.block_until_ready(out)

    ref = _ref_encoder(x, layers, mask=None)
    assert out.shape == (B, S, E)
    assert jnp.allclose(out, ref, atol=2e-3, rtol=2e-3), "mismatch vs reference"

    print("KERNEL_OK")
</pallas_src>

<mosaic_0001>
module attributes {stable_mosaic.version = 11 : i64} {
  func.func @_matmul_bias_kernel(%arg0: i32, %arg1: memref<8x128xf32, #tpu.memory_space<vmem>>, %arg2: memref<128x1536xf32, #tpu.memory_space<vmem>>, %arg3: memref<1x1536xf32, #tpu.memory_space<vmem>>, %arg4: memref<8x1536xf32, #tpu.memory_space<vmem>>) attributes {dimension_semantics = [#tpu.dimension_semantics<parallel>], iteration_bounds = array<i64: 2>, scalar_prefetch = 0 : i64, scratch_operands = 0 : i64, tpu.core_type = #tpu.core_type<tc>, window_params = [{transform_indices = @transform_0, window_bounds = array<i64: 8, 128>}, {pipeline_mode = #tpu.pipeline_mode<synchronous>, transform_indices = @transform_1, window_bounds = array<i64: 128, 1536>}, {pipeline_mode = #tpu.pipeline_mode<synchronous>, transform_indices = @transform_2, window_bounds = array<i64: 1, 1536>}, {transform_indices = @transform_3, window_bounds = array<i64: 8, 1536>}]} {
    %c0 = arith.constant 0 : index
    %c0_0 = arith.constant 0 : index
    %0 = vector.load %arg1[%c0, %c0_0] : memref<8x128xf32, #tpu.memory_space<vmem>>, vector<8x128xf32>
    %c0_1 = arith.constant 0 : index
    %c0_2 = arith.constant 0 : index
    %1 = vector.load %arg2[%c0_1, %c0_2] : memref<128x1536xf32, #tpu.memory_space<vmem>>, vector<128x1536xf32>
    %cst = arith.constant dense<0.000000e+00> : vector<8x1536xf32>
    %2 = tpu.matmul %0, %1, %cst {dimension_numbers = #tpu.dot_dimension_numbers<[1], [0], [0], [1], [0, 0, 1, 1], [], []>} : vector<8x128xf32>, vector<128x1536xf32>, vector<8x1536xf32> -> vector<8x1536xf32>
    %c0_3 = arith.constant 0 : index
    %c0_4 = arith.constant 0 : index
    %3 = vector.load %arg3[%c0_3, %c0_4] : memref<1x1536xf32, #tpu.memory_space<vmem>>, vector<1x1536xf32>
    %4 = vector.broadcast %3 : vector<1x1536xf32> to vector<8x1536xf32>
    %5 = arith.addf %2, %4 : vector<8x1536xf32>
    %c0_5 = arith.constant 0 : index
    %c0_6 = arith.constant 0 : index
    %6 = vector.load %arg4[%c0_5, %c0_6] : memref<8x1536xf32, #tpu.memory_space<vmem>>, vector<8x1536xf32>
    tpu.vector_store %arg4[%c0_5, %c0_6], %5 {strides = array<i32>} : memref<8x1536xf32, #tpu.memory_space<vmem>>, vector<8x1536xf32>,
    return
  }
  func.func @transform_0(%arg0: i32) -> (i32, i32) {
    %c0_i32 = arith.constant 0 : i32
    %c0_i32_0 = arith.constant 0 : i32
    return %arg0, %c0_i32 : i32, i32
  }
  func.func @transform_1(%arg0: i32) -> (i32, i32) {
    %c0_i32 = arith.constant 0 : i32
    %c0_i32_0 = arith.constant 0 : i32
    %c0_i32_1 = arith.constant 0 : i32
    return %c0_i32, %c0_i32_0 : i32, i32
  }
  func.func @transform_2(%arg0: i32) -> (i32, i32) {
    %c0_i32 = arith.constant 0 : i32
    %c0_i32_0 = arith.constant 0 : i32
    %c0_i32_1 = arith.constant 0 : i32
    return %c0_i32, %c0_i32_0 : i32, i32
  }
  func.func @transform_3(%arg0: i32) -> (i32, i32) {
    %c0_i32 = arith.constant 0 : i32
    %c0_i32_0 = arith.constant 0 : i32
    return %arg0, %c0_i32 : i32, i32
  }
}

</mosaic_0001>

<bundles_post_ra>
// kernel: tpu_custom_call.1
= control target key start
LH: loop header
LB: loop body
LE: loop exit
PB: predicated region body
PF: predicated region fallthrough
CT: control target
= control target key end

     0   :  { %8 = vsyncpa [#allocation3], 0  ;;  %s1737_s0 = inlined_call_operand.hbm [shape: f32[16,128], index: 0, kind: input, shape index: {}]   ;;  %s1738_s1 = inlined_call_operand.hbm [shape: f32[128,1536], index: 1, kind: input, shape index: {}]   ;;  %s1739_s2 = inlined_call_operand.hbm [shape: f32[1,1536], index: 2, kind: input, shape index: {}]   ;;  %s1740_s3 = inlined_call_operand.hbm [shape: f32[16,1536], index: 3, kind: output, shape index: {}]  }
   0x1   :  { %10 = vsyncpa [#allocation3 + $0x1], 0 }
   0x2   :  { %11 = vsyncpa [#allocation6], 0 }
   0x3   :  { %12 = vsyncpa [#allocation4], 0 }
   0x4   :  { %14 = vsyncpa [#allocation4 + $0x1], 0  ;;  %s1475_s12 = smov 0   ;;  %s1477_s13 = smov 0  }
   0x5   :  { %s1479_s14 = smov 0   ;;  %s1481_s15 = smov 0  }
   0x6 LB: > { %s1496_s16 = sadd.s32 4294967295, %s1446_s15   ;;  %s1012_s17 = sadd.s32 4294967294, %s1446_s15   ;;  %s1446_s15 = sphi %s1481_s15, %s1760_s15   ;;  %s1442_s14 = sphi %s1479_s14, %s1759_s14   ;;  %s1438_s13 = sphi %s1477_s13, %s1758_s13   ;;  %s1434_s12 = sphi %s1475_s12, %s1757_s12  }
   0x7   : > { %p40_p0 = scmp.ne.s32.totalorder %s1438_s13, %s1434_s12  ;;  %p1741_p1 = scmp.eq.s32.totalorder %s1496_s16, 0 }
   0x8   : > { %p112_p3 = scmp.eq.s32.totalorder %s1012_s17, 1  ;;  %p1013_p5 = scmp.ge.s32.totalorder %s1446_s15, 1 }
   0x9   : > { %p1505_p4 = por %p1741_p1, %p40_p0  ;;  %p119_p7 = scmp.lt.s32.totalorder %s1446_s15, 3 }
   0xa   : > { %p1510_p6 = por %p112_p3, %p40_p0  ;;  %s1448_s21 = smov [#allocation5]  }
   0xb   : > { %s1744_s18 = scalar_select %p1505_p4, 1, 0 }
   0xc   : > { %s1745_s19 = scalar_select %p1510_p6, 1, 0 }
   0xd   : > { %p1515_p8 = pnand %p1013_p5, %p119_p7  ;;  %s131_s22 = sshll.u32 %s1448_s21, 4  ;;  %s1519_s22 = int_to_ptr.vmem [resolvable:$true] %s131_s22 }
   0xe   : > { %s1449_s24 = smov [#allocation7]   ;;  %s1290_s28 = scalar_lea.hbm %s1738_s1, 24576 }
   0xf   : > { %p1232_p9 = pneg %p1515_p8  ;;  %s145_s25 = sshll.u32 %s1449_s24, 4  ;;  %s1530_s25 = int_to_ptr.vmem [resolvable:$true] %s145_s25 }
  0x10   : > { %p1291_p12 = scmp.ne.s32.totalorder %s1738_s1, %s1290_s28  ;;  %p1297_p5 = scmp.lt.u32.totalorder %s1290_s28, %s1738_s1 }
  0x11   : > { %p1526_p11 = pnand %p1232_p9, %p1741_p1 }
  0x13   : > { %p1292_p13 = pneg %p1526_p11 }
  0x15   : > { %p1293_p0 = pnand %p1292_p13, %p1291_p12 }
  0x17   : > { %p1294_p3 = pneg %p1293_p0 }
  0x19   : > { %p1299_p7 = pnand %p1297_p5, %p1294_p3 }
  0x1b   : > { %1302 = shalt.err (!%p1299_p7)
}
  0x1c   : > { %s1303_s6 = scalar_lea.vmem %s1519_s22, 24576  ;;  %p1311_p2 = scmp.lt.s32.totalorder %s1519_s22, %s1519_s22 }
  0x1d   : > { %p1304_p9 = scmp.ne.s32.totalorder %s1519_s22, %s1303_s6  ;;  %p1312_p12 = scmp.lt.s32.totalorder %s1303_s6, %s1303_s6 }
  0x1f   : > { %p1306_p10 = pnand %p1304_p9, %p1292_p13  ;;  %p1313_p0 = por %p1312_p12, %p1311_p2 }
  0x21   : > { %p1307_p1 = pneg %p1306_p10 }
  0x23   : > { %p1314_p6 = pnand %p1313_p0, %p1307_p1 }
  0x25   : > { %1317 = shalt.err (!%p1314_p6)
}
  0x26   : > { %s1450_s7 = smov 1536   ;;  %s1451_s8 = smov 96  }
  0x27   : > { %1235 = dma.hbm_to_vmem [thread:$0]  (!%p1526_p11), %s1738_s1, 24576, %s1519_s22, [#allocation6], %s1450_s7, %s1450_s7, %s1451_s8  }
  0x28   : > { %s1318_s21 = scalar_lea.hbm %s1739_s2, 192 }
  0x29   : > { %p1319_p2 = scmp.ne.s32.totalorder %s1739_s2, %s1318_s21  ;;  %p1325_p10 = scmp.lt.u32.totalorder %s1318_s21, %s1739_s2 }
  0x2b   : > { %p1321_p1 = pnand %p1319_p2, %p1292_p13 }
  0x2d   : > { %p1322_p6 = pneg %p1321_p1 }
  0x2f   : > { %p1327_p3 = pnand %p1325_p10, %p1322_p6 }
  0x31   : > { %1330 = shalt.err (!%p1327_p3)
}
  0x32   : > { %s1331_s22 = scalar_lea.vmem %s1530_s25, 192  ;;  %p1339_p12 = scmp.lt.s32.totalorder %s1530_s25, %s1530_s25 }
  0x33   : > { %p1332_p5 = scmp.ne.s32.totalorder %s1530_s25, %s1331_s22  ;;  %p1340_p0 = scmp.lt.s32.totalorder %s1331_s22, %s1331_s22 }
  0x35   : > { %p1334_p7 = pnand %p1332_p5, %p1292_p13  ;;  %p1341_p2 = por %p1340_p0, %p1339_p12 }
  0x37   : > { %p1335_p9 = pneg %p1334_p7 }
  0x39   : > { %p1342_p1 = pnand %p1341_p2, %p1335_p9 }
  0x3b   : > { %1345 = shalt.err (!%p1342_p1)
}
  0x3c   : > { %1238 = dma.hbm_to_vmem [thread:$0]  (!%p1526_p11), %s1739_s2, 192, %s1530_s25, [#allocation6]  }
  0x3d   : > { %s1585_s4 = sadd.s32 1, %s1446_s15   ;;  %s27_s23 = sadd.s32 1, %s1442_s14 }
  0x3e   : > { %s24_s5 = ssub.s32 %s1446_s15, %s1585_s4  ;;  %p34_p13 = scmp.ne.s32.totalorder %s1442_s14, %s1438_s13 }
  0x3f   : > { %p25_p6 = scmp.eq.s32.totalorder %s24_s5, 0  ;;  %p35_p10 = scmp.eq.s32.totalorder %s1446_s15, 0 }
  0x40   : > { %p1748_p3 = scmp.eq.s32.totalorder %s1496_s16, 1  ;;  %p1249_p7 = scmp.lt.s32.totalorder %s1446_s15, 2 }
  0x41   : > { %s1601_s7 = scalar_select %p25_p6, %s1442_s14, %s27_s23  }
  0x42   : > { %p1595_p5 = por %p1748_p3, %p34_p13  ;;  %p36_p9 = por %p35_p10, %p34_p13 }
  0x43   : > { %s156_s8 = sand.u32 1, %s1442_s14   ;;  %s1018_s25 = sshll.u32 %s1446_s15, 7 }
  0x44   : > { %s1749_s6 = scalar_select %p1595_p5, 1, 0 }
  0x45   : > { %s1017_s9 = sshll.u32 %s156_s8, 3  ;;  %s1608_s17 = scalar_lea.hbm %s1737_s0, %s1018_s25 }
  0x46   : > { %s160_s21 = scalar_lea.vmem [#allocation2], %s1017_s9  ;;  %p1612_p11 = pnand %p1249_p7, %p36_p9 }
  0x47   : > { %s167_s24 = sshll.u32 %s160_s21, 4  ;;  %s157_s27 = scalar_lea.sflag [#allocation3], %s156_s8  ;;  %s1610_s24 = int_to_ptr.vmem [resolvable:$true] %s167_s24 }
  0x48   : > { %s1346_s28 = scalar_lea.hbm %s1608_s17, 128  ;;  %p1348_p0 = pneg %p1612_p11 }
  0x49   : > { %p1347_p12 = scmp.ne.s32.totalorder %s1608_s17, %s1346_s28  ;;  %s1351_s30 = scalar_lea.hbm %s1737_s0, 256 }
  0x4a   : > { %p1352_p13 = scmp.lt.u32.totalorder %s1608_s17, %s1737_s0  ;;  %p1353_p6 = scmp.lt.u32.totalorder %s1351_s30, %s1346_s28 }
  0x4b   : > { %p1349_p2 = pnand %p1348_p0, %p1347_p12  ;;  %p1355_p3 = scmp.lt.u32.totalorder %s1346_s28, %s1608_s17 }
  0x4c   : > { %p1354_p10 = por %p1353_p6, %p1352_p13 }
  0x4d   : > { %p1350_p1 = pneg %p1349_p2 }
  0x4e   : > { %p1356_p7 = por %p1355_p3, %p1354_p10 }
  0x50   : > { %p1357_p9 = pnand %p1356_p7, %p1350_p1 }
  0x52   : > { %1360 = shalt.err (!%p1357_p9)
}
  0x53   : > { %s1361_s8 = scalar_lea.vmem %s1610_s24, 128  ;;  %s1452_s9 = smov [#allocation2]  }
  0x54   : > { %p1362_p12 = scmp.ne.s32.totalorder %s1610_s24, %s1361_s8  ;;  %s1366_s25 = sshll.u32 %s1452_s9, 4  ;;  %s1367_s25 = int_to_ptr.vmem [resolvable:$false] %s1366_s25 }
  0x55   : > { %s1368_s10 = scalar_lea.vmem %s1367_s25, 256  ;;  %p1369_p4 = scmp.lt.s32.totalorder %s1610_s24, %s1367_s25 }
  0x56   : > { %p1364_p2 = pnand %p1362_p12, %p1348_p0  ;;  %p1370_p13 = scmp.lt.s32.totalorder %s1368_s10, %s1361_s8 }
  0x58   : > { %p1365_p5 = pneg %p1364_p2  ;;  %p1371_p6 = por %p1370_p13, %p1369_p4 }
  0x5a   : > { %p1372_p10 = pnand %p1371_p6, %p1365_p5 }
  0x5c   : > { %1375 = shalt.err (!%p1372_p10)
}
  0x5d   : > { %1242 = dma.hbm_to_vmem [thread:$0]  (!%p1612_p11), %s1608_s17, 128, %s1610_s24, %s157_s27  }
  0x5e   : > { %176 = sbr.rel (%p1515_p8) target bundleno = 435 (0x1b3), region = 32  ;;  %s1644_s11 = sand.u32 (!%p1515_p8), 1, %s1438_s13  }
  0x5f   : > { %s1020_s21 = sshll.u32 (!%p1515_p8), %s1644_s11, 3  ;;  %s179_s28 = scalar_lea.sflag (!%p1515_p8), [#allocation3], %s1644_s11 }
  0x60   : > { %s1648_s22 = scalar_lea.vmem (!%p1515_p8), [#allocation2], %s1020_s21  ;;  %p1751_p4 = scmp.ne.s32.totalorder (!%p1515_p8), %s1744_s18, 0 }
  0x65   : > { %1421 = dma.done.wait (%p1751_p4), %s179_s28, 128  }
  0x66   : > { %1423 = vsyncadd (%p1751_p4), %s179_s28, 4294967168  ;;  %p1752_p5 = scmp.eq.s32.totalorder %s1496_s16, 0 }
  0x68   : > { %1425 = dma.done.wait (%p1752_p5), [#allocation6], 24768   ;;  %p1753_p8 = pmov %p1752_p5 }
  0x69   : > { %v1453_v0 = vmov 0.0   ;;  %v215_v1 = vld [vmem:[#allocation5 + $0x8] sm:$0xff]  ;;  %v217_v3 = vld [vmem:[#allocation5 + $0x18] sm:$0xff]  ;;  %v214_v6 = vld [vmem:[#allocation5] sm:$0xff]  ;;  %s1218_s18 = smul.u32 96, %s1644_s11  ;;  %p1754_p0 = scmp.ne.s32.totalorder %s1749_s6, 0 }
  0x6a   : > { %1427 = vsyncadd (%p1753_p8), [#allocation6], 4294942528  ;;  %534 = vmatprep.mubr.f32.mxu0 %v1453_v0  ;;  %605 = vmatprep.mubr.f32.mxu1 %v1453_v0  ;;  %v227_v2 = vld [vmem:[#allocation5 + $0x68] sm:$0xff]  ;;  %v229_v5 = vld [vmem:[#allocation5 + $0x78] sm:$0xff]  ;;  %s1219_s17 = smul.u32 1536, %s1496_s16  ;;  %s909_s16 = scalar_lea.sflag [#allocation4], %s1644_s11 }
  0x6b   : > { %v1026_v4 = vpack.c.bf16 %v227_v2, %v215_v1  ;;  %v226_v7 = vld [vmem:[#allocation5 + $0x60] sm:$0xff]  ;;  %v1058_v8 = vpack.c.bf16 %v229_v5, %v217_v3  ;;  %v216_v10 = vld [vmem:[#allocation5 + $0x10] sm:$0xff]  ;;  %v239_v12 = vld [vmem:[#allocation5 + $0xc8] sm:$0xff]  ;;  %s1674_s20 = scalar_lea.vmem [#allocation8], %s1218_s18  ;;  %s1454_s23 = smov [#allocation8]  }
  0x6c   : > { %v1028_v9 = vpack.c.bf16 %v226_v7, %v214_v6  ;;  %v228_v11 = vld [vmem:[#allocation5 + $0x70] sm:$0xff]  ;;  %v251_v14 = vld [vmem:[#allocation5 + $0x128] sm:$0xff]  ;;  %v241_v15 = vld [vmem:[#allocation5 + $0xd8] sm:$0xff]  ;;  %s923_s24 = sshll.u32 %s1674_s20, 4  ;;  %s1690_s29 = scalar_lea.hbm %s1740_s3, %s1219_s17  ;;  %s1692_s24 = int_to_ptr.vmem [resolvable:$true] %s923_s24 }
  0x6d   : > { %1027 = vmatprep.subr.bf16.mxu0 %v1026_v4  ;;  %v1060_v13 = vpack.c.bf16 %v228_v11, %v216_v10  ;;  %v253_v16 = vld [vmem:[#allocation5 + $0x138] sm:$0xff]  ;;  %1059 = vmatprep.subr.bf16.mxu1 %v1058_v8  ;;  %v1030_v17 = vpack.c.bf16 %v251_v14, %v239_v12  ;;  %v238_v19 = vld [vmem:[#allocation5 + $0xc0] sm:$0xff]  ;;  %v240_v21 = vld [vmem:[#allocation5 + $0xd0] sm:$0xff]  ;;  %s1376_s30 = scalar_lea.vmem %s1692_s24, 1536  ;;  %s1380_s5 = sshll.u32 %s1454_s23, 4  ;;  %s1381_s5 = int_to_ptr.vmem [resolvable:$false] %s1380_s5 }
  0x6e   : > { %1029 = vmatpush1.bf16.msra.mxu0 %v1028_v9  ;;  %v1062_v18 = vpack.c.bf16 %v253_v16, %v241_v15  ;;  %v250_v20 = vld [vmem:[#allocation5 + $0x120] sm:$0xff]  ;;  %v252_v23 = vld [vmem:[#allocation5 + $0x130] sm:$0xff]  ;;  %v263_v24 = vld [vmem:[#allocation5 + $0x188] sm:$0xff]  ;;  %p1377_p11 = scmp.ne.s32.totalorder %s1692_s24, %s1376_s30  ;;  %s1382_s8 = scalar_lea.vmem %s1381_s5, 3072 }
  0x6f   : > { %1061 = vmatpush1.bf16.msra.mxu1 %v1060_v13  ;;  %v1032_v22 = vpack.c.bf16 %v250_v20, %v238_v19  ;;  %v275_v25 = vld [vmem:[#allocation5 + $0x1e8] sm:$0xff]  ;;  %1031 = vmatprep.subr.bf16.mxu0 %v1030_v17  ;;  %v1064_v26 = vpack.c.bf16 %v252_v23, %v240_v21  ;;  %v265_v28 = vld [vmem:[#allocation5 + $0x198] sm:$0xff]  ;;  %v262_v30 = vld [vmem:[#allocation5 + $0x180] sm:$0xff]  ;;  %p1383_p7 = scmp.lt.s32.totalorder %s1692_s24, %s1381_s5  ;;  %p1384_p9 = scmp.lt.s32.totalorder %s1382_s8, %s1376_s30 }
  0x70   : > { %1063 = vmatprep.subr.bf16.mxu1 %v1062_v18  ;;  %v1034_v27 = vpack.c.bf16 %v275_v25, %v263_v24  ;;  %v277_v29 = vld [vmem:[#allocation5 + $0x1f8] sm:$0xff]  ;;  %v274_v32 = vld [vmem:[#allocation5 + $0x1e0] sm:$0xff]  ;;  %v264_v33 = vld [vmem:[#allocation5 + $0x190] sm:$0xff]  ;;  %p1378_p1 = pnand %p1377_p11, %p1754_p0 }
  0x71   : > { %v1066_v31 = vpack.c.bf16 %v277_v29, %v265_v28  ;;  %v276_v34 = vld [vmem:[#allocation5 + $0x1f0] sm:$0xff]  ;;  %v1036_v35 = vpack.c.bf16 %v274_v32, %v262_v30  ;;  %v287_v36 = vld [vmem:[#allocation5 + $0x248] sm:$0xff]  ;;  %v289_v38 = vld [vmem:[#allocation5 + $0x258] sm:$0xff]  ;;  %p1385_p12 = por %p1384_p9, %p1383_p7 }
  0x72   : > { %1033 = vmatpush1.bf16.msra.mxu0 %v1032_v22  ;;  %v299_v37 = vld [vmem:[#allocation5 + $0x2a8] sm:$0xff]  ;;  %v1068_v39 = vpack.c.bf16 %v276_v34, %v264_v33  ;;  %v301_v41 = vld [vmem:[#allocation5 + $0x2b8] sm:$0xff]  ;;  %v286_v42 = vld [vmem:[#allocation5 + $0x240] sm:$0xff]  ;;  %p1379_p3 = pneg %p1378_p1 }
  0x73   : > { %1065 = vmatpush1.bf16.msra.mxu1 %v1064_v26  ;;  %1035 = vmatprep.subr.bf16.mxu0 %v1034_v27  ;;  %v1038_v40 = vpack.c.bf16 %v299_v37, %v287_v36  ;;  %v298_v43 = vld [vmem:[#allocation5 + $0x2a0] sm:$0xff]  ;;  %v1070_v44 = vpack.c.bf16 %v301_v41, %v289_v38  ;;  %v288_v45 = vld [vmem:[#allocation5 + $0x250] sm:$0xff]  ;;  %v311_v47 = vld [vmem:[#allocation5 + $0x308] sm:$0xff] }
  0x74   : > { %1067 = vmatprep.subr.bf16.mxu1 %v1066_v31  ;;  %v300_v46 = vld [vmem:[#allocation5 + $0x2b0] sm:$0xff]  ;;  %v323_v48 = vld [vmem:[#allocation5 + $0x368] sm:$0xff]  ;;  %v313_v49 = vld [vmem:[#allocation5 + $0x318] sm:$0xff]  ;;  %v1040_v51 = vpack.c.bf16 %v298_v43, %v286_v42  ;;  %p1386_p2 = pnand %p1385_p12, %p1379_p3 }
  0x75   : > { %v325_v50 = vld [vmem:[#allocation5 + $0x378] sm:$0xff]  ;;  %v1072_v52 = vpack.c.bf16 %v300_v46, %v288_v45  ;;  %v1042_v53 = vpack.c.bf16 %v323_v48, %v311_v47  ;;  %v310_v54 = vld [vmem:[#allocation5 + $0x300] sm:$0xff]  ;;  %v312_v56 = vld [vmem:[#allocation5 + $0x310] sm:$0xff] }
  0x76   : > { %1037 = vmatpush1.bf16.msra.mxu0 %v1036_v35  ;;  %v322_v55 = vld [vmem:[#allocation5 + $0x360] sm:$0xff]  ;;  %v1074_v57 = vpack.c.bf16 %v325_v50, %v313_v49  ;;  %v324_v58 = vld [vmem:[#allocation5 + $0x370] sm:$0xff]  ;;  %v335_v59 = vld [vmem:[#allocation5 + $0x3c8] sm:$0xff] }
  0x77   : > { %1069 = vmatpush1.bf16.msra.mxu1 %v1068_v39  ;;  %1039 = vmatprep.subr.bf16.mxu0 %v1038_v40  ;;  %v347_v60 = vld [vmem:[#allocation5 + $0x428] sm:$0xff]  ;;  %v337_v61 = vld [vmem:[#allocation5 + $0x3d8] sm:$0xff]  ;;  %v1044_v63 = vpack.c.bf16 %v322_v55, %v310_v54  ;;  %v1076_v1 = vpack.c.bf16 %v324_v58, %v312_v56  ;;  %v334_v3 = vld [vmem:[#allocation5 + $0x3c0] sm:$0xff] }
  0x78   : > { %1071 = vmatprep.subr.bf16.mxu1 %v1070_v44  ;;  %v349_v62 = vld [vmem:[#allocation5 + $0x438] sm:$0xff]  ;;  %v1046_v2 = vpack.c.bf16 %v347_v60, %v335_v59  ;;  %v346_v4 = vld [vmem:[#allocation5 + $0x420] sm:$0xff]  ;;  %v336_v5 = vld [vmem:[#allocation5 + $0x3d0] sm:$0xff] }
  0x79   : > { %v1078_v6 = vpack.c.bf16 %v349_v62, %v337_v61  ;;  %v348_v7 = vld [vmem:[#allocation5 + $0x430] sm:$0xff]  ;;  %v359_v8 = vld [vmem:[#allocation5 + $0x488] sm:$0xff]  ;;  %v361_v10 = vld [vmem:[#allocation5 + $0x498] sm:$0xff]  ;;  %v1048_v12 = vpack.c.bf16 %v346_v4, %v334_v3 }
  0x7a   : > { %1041 = vmatpush1.bf16.msra.mxu0 %v1040_v51  ;;  %v371_v9 = vld [vmem:[#allocation5 + $0x4e8] sm:$0xff]  ;;  %v373_v11 = vld [vmem:[#allocation5 + $0x4f8] sm:$0xff]  ;;  %v1080_v13 = vpack.c.bf16 %v348_v7, %v336_v5  ;;  %v358_v15 = vld [vmem:[#allocation5 + $0x480] sm:$0xff] }
  0x7b   : > { %1073 = vmatpush1.bf16.msra.mxu1 %v1072_v52  ;;  %1043 = vmatprep.subr.bf16.mxu0 %v1042_v53  ;;  %v1050_v14 = vpack.c.bf16 %v371_v9, %v359_v8  ;;  %v370_v16 = vld [vmem:[#allocation5 + $0x4e0] sm:$0xff]  ;;  %v360_v17 = vld [vmem:[#allocation5 + $0x490] sm:$0xff]  ;;  %v1082_v18 = vpack.c.bf16 %v373_v11, %v361_v10  ;;  %v383_v20 = vld [vmem:[#allocation5 + $0x548] sm:$0xff] }
  0x7c   : > { %1075 = vmatprep.subr.bf16.mxu1 %v1074_v57  ;;  %v372_v19 = vld [vmem:[#allocation5 + $0x4f0] sm:$0xff]  ;;  %v395_v21 = vld [vmem:[#allocation5 + $0x5a8] sm:$0xff]  ;;  %v385_v22 = vld [vmem:[#allocation5 + $0x558] sm:$0xff]  ;;  %v1052_v24 = vpack.c.bf16 %v370_v16, %v358_v15 }
  0x7d   : > { %v397_v23 = vld [vmem:[#allocation5 + $0x5b8] sm:$0xff]  ;;  %v1084_v25 = vpack.c.bf16 %v372_v19, %v360_v17  ;;  %v1054_v26 = vpack.c.bf16 %v395_v21, %v383_v20  ;;  %v382_v27 = vld [vmem:[#allocation5 + $0x540] sm:$0xff]  ;;  %v384_v29 = vld [vmem:[#allocation5 + $0x550] sm:$0xff] }
  0x7e   : > { %1045 = vmatpush1.bf16.msra.mxu0 %v1044_v63  ;;  %v394_v28 = vld [vmem:[#allocation5 + $0x5a0] sm:$0xff]  ;;  %v1086_v30 = vpack.c.bf16 %v397_v23, %v385_v22  ;;  %v396_v31 = vld [vmem:[#allocation5 + $0x5b0] sm:$0xff]  ;;  %v219_v32 = vld [vmem:[#allocation5 + $0x28] sm:$0xff] }
  0x7f   : > { %1077 = vmatpush1.bf16.msra.mxu1 %v1076_v1  ;;  %1047 = vmatprep.subr.bf16.mxu0 %v1046_v2  ;;  %v231_v33 = vld [vmem:[#allocation5 + $0x88] sm:$0xff]  ;;  %v221_v34 = vld [vmem:[#allocation5 + $0x38] sm:$0xff]  ;;  %v1056_v36 = vpack.c.bf16 %v394_v28, %v382_v27  ;;  %v1088_v37 = vpack.c.bf16 %v396_v31, %v384_v29  ;;  %v218_v39 = vld [vmem:[#allocation5 + $0x20] sm:$0xff] }
  0x80   : > { %1079 = vmatprep.subr.bf16.mxu1 %v1078_v6  ;;  %v233_v35 = vld [vmem:[#allocation5 + $0x98] sm:$0xff]  ;;  %v1090_v38 = vpack.c.bf16 %v231_v33, %v219_v32  ;;  %v230_v40 = vld [vmem:[#allocation5 + $0x80] sm:$0xff]  ;;  %v220_v41 = vld [vmem:[#allocation5 + $0x30] sm:$0xff] }
  0x81   : > { %v1122_v42 = vpack.c.bf16 %v233_v35, %v221_v34  ;;  %v232_v43 = vld [vmem:[#allocation5 + $0x90] sm:$0xff]  ;;  %v243_v44 = vld [vmem:[#allocation5 + $0xe8] sm:$0xff]  ;;  %v245_v46 = vld [vmem:[#allocation5 + $0xf8] sm:$0xff]  ;;  %v1092_v49 = vpack.c.bf16 %v230_v40, %v218_v39 }
  0x82   : > { %1049 = vmatpush1.bf16.msra.mxu0 %v1048_v12  ;;  %v255_v45 = vld [vmem:[#allocation5 + $0x148] sm:$0xff]  ;;  %v257_v47 = vld [vmem:[#allocation5 + $0x158] sm:$0xff]  ;;  %v1124_v50 = vpack.c.bf16 %v232_v43, %v220_v41  ;;  %v242_v52 = vld [vmem:[#allocation5 + $0xe0] sm:$0xff] }
  0x83   : > { %1081 = vmatpush1.bf16.msra.mxu1 %v1080_v13  ;;  %1051 = vmatprep.subr.bf16.mxu0 %v1050_v14  ;;  %v1661_v48 = vld [vmem:[%s1648_s22] sm:$0xff]  ;;  %v1094_v51 = vpack.c.bf16 %v255_v45, %v243_v44  ;;  %v254_v53 = vld [vmem:[#allocation5 + $0x140] sm:$0xff]  ;;  %v1126_v55 = vpack.c.bf16 %v257_v47, %v245_v46  ;;  %v267_v57 = vld [vmem:[#allocation5 + $0x1a8] sm:$0xff] }
  0x84   : > { %1083 = vmatprep.subr.bf16.mxu1 %v1082_v18  ;;  %v244_v54 = vld [vmem:[#allocation5 + $0xf0] sm:$0xff]  ;;  %v279_v58 = vld [vmem:[#allocation5 + $0x208] sm:$0xff]  ;;  %v269_v59 = vld [vmem:[#allocation5 + $0x1b8] sm:$0xff]  ;;  %v1096_v61 = vpack.c.bf16 %v254_v53, %v242_v52 }
  0x85   : > { %v256_v56 = vld [vmem:[#allocation5 + $0x150] sm:$0xff]  ;;  %v281_v60 = vld [vmem:[#allocation5 + $0x218] sm:$0xff]  ;;  %v1098_v63 = vpack.c.bf16 %v279_v58, %v267_v57  ;;  %v266_v1 = vld [vmem:[#allocation5 + $0x1a0] sm:$0xff] }
  0x86   : > { %1053 = vmatpush1.bf16.msra.mxu0 %v1052_v24  ;;  %v1128_v62 = vpack.c.bf16 %v256_v56, %v244_v54  ;;  %v278_v2 = vld [vmem:[#allocation5 + $0x200] sm:$0xff]  ;;  %v268_v3 = vld [vmem:[#allocation5 + $0x1b0] sm:$0xff]  ;;  %v1130_v4 = vpack.c.bf16 %v281_v60, %v269_v59  ;;  %v291_v6 = vld [vmem:[#allocation5 + $0x268] sm:$0xff] }
  0x87   : > { %1085 = vmatpush1.bf16.msra.mxu1 %v1084_v25  ;;  %1055 = vmatprep.subr.bf16.mxu0 %v1054_v26  ;;  %v280_v5 = vld [vmem:[#allocation5 + $0x210] sm:$0xff]  ;;  %v303_v7 = vld [vmem:[#allocation5 + $0x2c8] sm:$0xff]  ;;  %v293_v8 = vld [vmem:[#allocation5 + $0x278] sm:$0xff]  ;;  %v1100_v10 = vpack.c.bf16 %v278_v2, %v266_v1 }
  0x88   : > { %1087 = vmatprep.subr.bf16.mxu1 %v1086_v30  ;;  %v305_v9 = vld [vmem:[#allocation5 + $0x2d8] sm:$0xff]  ;;  %v1132_v11 = vpack.c.bf16 %v280_v5, %v268_v3  ;;  %v1102_v12 = vpack.c.bf16 %v303_v7, %v291_v6  ;;  %v290_v13 = vld [vmem:[#allocation5 + $0x260] sm:$0xff]  ;;  %v292_v15 = vld [vmem:[#allocation5 + $0x270] sm:$0xff] }
  0x89   : > { %v302_v14 = vld [vmem:[#allocation5 + $0x2c0] sm:$0xff]  ;;  %v1134_v16 = vpack.c.bf16 %v305_v9, %v293_v8  ;;  %v304_v17 = vld [vmem:[#allocation5 + $0x2d0] sm:$0xff]  ;;  %v315_v18 = vld [vmem:[#allocation5 + $0x328] sm:$0xff] }
  0x8a   : > { %1057 = vmatpush1.bf16.msra.mxu0 %v1056_v36  ;;  %v327_v19 = vld [vmem:[#allocation5 + $0x388] sm:$0xff]  ;;  %v317_v20 = vld [vmem:[#allocation5 + $0x338] sm:$0xff]  ;;  %v1104_v22 = vpack.c.bf16 %v302_v14, %v290_v13  ;;  %v1136_v23 = vpack.c.bf16 %v304_v17, %v292_v15  ;;  %v314_v25 = vld [vmem:[#allocation5 + $0x320] sm:$0xff] }
  0x8b   : > { %1089 = vmatpush1.bf16.msra.mxu1 %v1088_v37  ;;  %1091 = vmatprep.subr.bf16.mxu0 %v1090_v38  ;;  %v329_v21 = vld [vmem:[#allocation5 + $0x398] sm:$0xff]  ;;  %v1106_v24 = vpack.c.bf16 %v327_v19, %v315_v18  ;;  %v326_v26 = vld [vmem:[#allocation5 + $0x380] sm:$0xff]  ;;  %v316_v27 = vld [vmem:[#allocation5 + $0x330] sm:$0xff] }
  0x8c   : > { %1123 = vmatprep.subr.bf16.mxu1 %v1122_v42  ;;  %v1138_v28 = vpack.c.bf16 %v329_v21, %v317_v20  ;;  %v328_v29 = vld [vmem:[#allocation5 + $0x390] sm:$0xff]  ;;  %v339_v30 = vld [vmem:[#allocation5 + $0x3e8] sm:$0xff]  ;;  %v341_v32 = vld [vmem:[#allocation5 + $0x3f8] sm:$0xff]  ;;  %v1108_v34 = vpack.c.bf16 %v326_v26, %v314_v25 }
  0x8d   : > { %535 = vmatmul.mubr.f32.vlgmr.msra.gmra.mrb[0].mxu0 %v1661_v48  ;;  %v351_v31 = vld [vmem:[#allocation5 + $0x448] sm:$0xff]  ;;  %v353_v33 = vld [vmem:[#allocation5 + $0x458] sm:$0xff]  ;;  %v1140_v35 = vpack.c.bf16 %v328_v29, %v316_v27  ;;  %v338_v37 = vld [vmem:[#allocation5 + $0x3e0] sm:$0xff] }
  0x8e   : > { %606 = vmatmul.mubr.f32.vlgmr.msra.gmra.mrb[0].mxu1 %v1661_v48  ;;  %1093 = vmatpush1.bf16.msra.mxu0 %v1092_v49  ;;  %v1110_v36 = vpack.c.bf16 %v351_v31, %v339_v30  ;;  %v350_v38 = vld [vmem:[#allocation5 + $0x440] sm:$0xff]  ;;  %v340_v39 = vld [vmem:[#allocation5 + $0x3f0] sm:$0xff]  ;;  %v1142_v40 = vpack.c.bf16 %v353_v33, %v341_v32  ;;  %v363_v42 = vld [vmem:[#allocation5 + $0x4a8] sm:$0xff] }
  0x8f   : > { %1125 = vmatpush1.bf16.msra.mxu1 %v1124_v50  ;;  %1095 = vmatprep.subr.bf16.mxu0 %v1094_v51  ;;  %v352_v41 = vld [vmem:[#allocation5 + $0x450] sm:$0xff]  ;;  %v375_v43 = vld [vmem:[#allocation5 + $0x508] sm:$0xff]  ;;  %v365_v44 = vld [vmem:[#allocation5 + $0x4b8] sm:$0xff]  ;;  %v1112_v46 = vpack.c.bf16 %v350_v38, %v338_v37 }
  0x90   : > { %1127 = vmatprep.subr.bf16.mxu1 %v1126_v55  ;;  %676 = vmatprep.mubr.f32.mxu0 %v1453_v0  ;;  %v377_v45 = vld [vmem:[#allocation5 + $0x518] sm:$0xff]  ;;  %v1144_v47 = vpack.c.bf16 %v352_v41, %v340_v39  ;;  %v1114_v49 = vpack.c.bf16 %v375_v43, %v363_v42  ;;  %v362_v50 = vld [vmem:[#allocation5 + $0x4a0] sm:$0xff]  ;;  %v364_v52 = vld [vmem:[#allocation5 + $0x4b0] sm:$0xff] }
  0x91   : > { %747 = vmatprep.mubr.f32.mxu1 %v1453_v0  ;;  %v374_v51 = vld [vmem:[#allocation5 + $0x500] sm:$0xff]  ;;  %v1146_v53 = vpack.c.bf16 %v377_v45, %v365_v44  ;;  %v376_v54 = vld [vmem:[#allocation5 + $0x510] sm:$0xff]  ;;  %v387_v55 = vld [vmem:[#allocation5 + $0x568] sm:$0xff] }
  0x92   : > { %1097 = vmatpush1.bf16.msra.mxu0 %v1096_v61  ;;  %v399_v56 = vld [vmem:[#allocation5 + $0x5c8] sm:$0xff]  ;;  %v389_v57 = vld [vmem:[#allocation5 + $0x578] sm:$0xff]  ;;  %v1116_v59 = vpack.c.bf16 %v374_v51, %v362_v50  ;;  %v1148_v60 = vpack.c.bf16 %v376_v54, %v364_v52  ;;  %v388_v1 = vld [vmem:[#allocation5 + $0x570] sm:$0xff] }
  0x93   : > { %1129 = vmatpush1.bf16.msra.mxu1 %v1128_v62  ;;  %1099 = vmatprep.subr.bf16.mxu0 %v1098_v63  ;;  %v401_v58 = vld [vmem:[#allocation5 + $0x5d8] sm:$0xff]  ;;  %v1118_v61 = vpack.c.bf16 %v399_v56, %v387_v55  ;;  %v386_v62 = vld [vmem:[#allocation5 + $0x560] sm:$0xff]  ;;  %v400_v3 = vld [vmem:[#allocation5 + $0x5d0] sm:$0xff] }
  0x94   : > { %1131 = vmatprep.subr.bf16.mxu1 %v1130_v4  ;;  %v398_v63 = vld [vmem:[#allocation5 + $0x5c0] sm:$0xff]  ;;  %v1150_v2 = vpack.c.bf16 %v401_v58, %v389_v57  ;;  %v223_v4 = vld [vmem:[#allocation5 + $0x48] sm:$0xff]  ;;  %v225_v6 = vld [vmem:[#allocation5 + $0x58] sm:$0xff]  ;;  %v1152_v9 = vpack.c.bf16 %v400_v3, %v388_v1 }
  0x95   : > { %v235_v5 = vld [vmem:[#allocation5 + $0xa8] sm:$0xff]  ;;  %v237_v7 = vld [vmem:[#allocation5 + $0xb8] sm:$0xff]  ;;  %v1120_v8 = vpack.c.bf16 %v398_v63, %v386_v62  ;;  %v224_v13 = vld [vmem:[#allocation5 + $0x50] sm:$0xff] }
  0x96   : > { %1101 = vmatpush1.bf16.msra.mxu0 %v1100_v10  ;;  %v1154_v10 = vpack.c.bf16 %v235_v5, %v223_v4  ;;  %v1186_v14 = vpack.c.bf16 %v237_v7, %v225_v6  ;;  %v236_v15 = vld [vmem:[#allocation5 + $0xb0] sm:$0xff]  ;;  %v259_v17 = vld [vmem:[#allocation5 + $0x168] sm:$0xff]  ;;  %v249_v18 = vld [vmem:[#allocation5 + $0x118] sm:$0xff] }
  0x97   : > { %1133 = vmatpush1.bf16.msra.mxu1 %v1132_v11  ;;  %1103 = vmatprep.subr.bf16.mxu0 %v1102_v12  ;;  %v222_v11 = vld [vmem:[#allocation5 + $0x40] sm:$0xff]  ;;  %v261_v19 = vld [vmem:[#allocation5 + $0x178] sm:$0xff]  ;;  %v1188_v21 = vpack.c.bf16 %v236_v15, %v224_v13  ;;  %v248_v25 = vld [vmem:[#allocation5 + $0x110] sm:$0xff] }
  0x98   : > { %1135 = vmatprep.subr.bf16.mxu1 %v1134_v16  ;;  %v234_v12 = vld [vmem:[#allocation5 + $0xa0] sm:$0xff]  ;;  %v247_v16 = vld [vmem:[#allocation5 + $0x108] sm:$0xff]  ;;  %v1190_v26 = vpack.c.bf16 %v261_v19, %v249_v18  ;;  %v260_v27 = vld [vmem:[#allocation5 + $0x170] sm:$0xff] }
  0x99   : > { %v1156_v20 = vpack.c.bf16 %v234_v12, %v222_v11  ;;  %v283_v29 = vld [vmem:[#allocation5 + $0x228] sm:$0xff]  ;;  %v273_v30 = vld [vmem:[#allocation5 + $0x1d8] sm:$0xff]  ;;  %v1192_v33 = vpack.c.bf16 %v260_v27, %v248_v25  ;;  %v272_v37 = vld [vmem:[#allocation5 + $0x1d0] sm:$0xff] }
  0x9a   : > { %1105 = vmatpush1.bf16.msra.mxu0 %v1104_v22  ;;  %v1158_v22 = vpack.c.bf16 %v259_v17, %v247_v16  ;;  %v285_v31 = vld [vmem:[#allocation5 + $0x238] sm:$0xff]  ;;  %v284_v39 = vld [vmem:[#allocation5 + $0x230] sm:$0xff]  ;;  %v307_v41 = vld [vmem:[#allocation5 + $0x2e8] sm:$0xff] }
  0x9b   : > { %1137 = vmatpush1.bf16.msra.mxu1 %v1136_v23  ;;  %1107 = vmatprep.subr.bf16.mxu0 %v1106_v24  ;;  %v246_v23 = vld [vmem:[#allocation5 + $0x100] sm:$0xff]  ;;  %v1194_v38 = vpack.c.bf16 %v285_v31, %v273_v30  ;;  %v297_v42 = vld [vmem:[#allocation5 + $0x298] sm:$0xff]  ;;  %v1196_v45 = vpack.c.bf16 %v284_v39, %v272_v37  ;;  %v296_v50 = vld [vmem:[#allocation5 + $0x290] sm:$0xff]  ;;  %v410_v39 = vlaneseq }
  0x9c   : > { %1139 = vmatprep.subr.bf16.mxu1 %v1138_v28  ;;  %v258_v24 = vld [vmem:[#allocation5 + $0x160] sm:$0xff]  ;;  %v271_v28 = vld [vmem:[#allocation5 + $0x1c8] sm:$0xff]  ;;  %v309_v43 = vld [vmem:[#allocation5 + $0x2f8] sm:$0xff] }
  0x9d   : > { %v1160_v32 = vpack.c.bf16 %v258_v24, %v246_v23  ;;  %v1198_v51 = vpack.c.bf16 %v309_v43, %v297_v42  ;;  %v308_v52 = vld [vmem:[#allocation5 + $0x2f0] sm:$0xff]  ;;  %v331_v54 = vld [vmem:[#allocation5 + $0x3a8] sm:$0xff]  ;;  %v321_v55 = vld [vmem:[#allocation5 + $0x358] sm:$0xff] }
  0x9e   : > { %1109 = vmatpush1.bf16.msra.mxu0 %v1108_v34  ;;  %v1162_v34 = vpack.c.bf16 %v283_v29, %v271_v28  ;;  %v333_v56 = vld [vmem:[#allocation5 + $0x3b8] sm:$0xff]  ;;  %v332_v63 = vld [vmem:[#allocation5 + $0x3b0] sm:$0xff]  ;;  %v343_v1 = vld [vmem:[#allocation5 + $0x408] sm:$0xff] }
  0x9f   : > { %1141 = vmatpush1.bf16.msra.mxu1 %v1140_v35  ;;  %1111 = vmatprep.subr.bf16.mxu0 %v1110_v36  ;;  %v270_v35 = vld [vmem:[#allocation5 + $0x1c0] sm:$0xff]  ;;  %v1202_v62 = vpack.c.bf16 %v333_v56, %v321_v55  ;;  %v345_v3 = vld [vmem:[#allocation5 + $0x418] sm:$0xff]  ;;  %v356_v12 = vld [vmem:[#allocation5 + $0x470] sm:$0xff] }
  0xa0   : > { %1143 = vmatprep.subr.bf16.mxu1 %v1142_v40  ;;  %v282_v36 = vld [vmem:[#allocation5 + $0x220] sm:$0xff]  ;;  %v295_v40 = vld [vmem:[#allocation5 + $0x288] sm:$0xff]  ;;  %v357_v4 = vld [vmem:[#allocation5 + $0x478] sm:$0xff] }
  0xa1   : > { %v1164_v44 = vpack.c.bf16 %v282_v36, %v270_v35  ;;  %v1206_v11 = vpack.c.bf16 %v357_v4, %v345_v3  ;;  %v367_v13 = vld [vmem:[#allocation5 + $0x4c8] sm:$0xff]  ;;  %v369_v15 = vld [vmem:[#allocation5 + $0x4d8] sm:$0xff]  ;;  %v380_v24 = vld [vmem:[#allocation5 + $0x530] sm:$0xff] }
  0xa2   : > { %1113 = vmatpush1.bf16.msra.mxu0 %v1112_v46  ;;  %v1166_v46 = vpack.c.bf16 %v307_v41, %v295_v40  ;;  %v381_v16 = vld [vmem:[#allocation5 + $0x538] sm:$0xff]  ;;  %v391_v25 = vld [vmem:[#allocation5 + $0x588] sm:$0xff]  ;;  %v392_v35 = vld [vmem:[#allocation5 + $0x590] sm:$0xff]  ;;  %v411_v40 = vshrl.u32 %v410_v39, 7 }
  0xa3   : > { %1145 = vmatpush1.bf16.msra.mxu1 %v1144_v47  ;;  %1115 = vmatprep.subr.bf16.mxu0 %v1114_v49  ;;  %v294_v47 = vld [vmem:[#allocation5 + $0x280] sm:$0xff]  ;;  %v1210_v23 = vpack.c.bf16 %v381_v16, %v369_v15  ;;  %v393_v27 = vld [vmem:[#allocation5 + $0x598] sm:$0xff]  ;;  %v404_v36 = vld [vmem:[#allocation5 + $0x5f0] sm:$0xff] }
  0xa4   : > { %1147 = vmatprep.subr.bf16.mxu1 %v1146_v53  ;;  %v306_v49 = vld [vmem:[#allocation5 + $0x2e0] sm:$0xff]  ;;  %v319_v53 = vld [vmem:[#allocation5 + $0x348] sm:$0xff]  ;;  %v405_v28 = vld [vmem:[#allocation5 + $0x5f8] sm:$0xff]  ;;  %v412_v41 = vsub.s32 0, %v411_v40  ;;  %v420_v43 = vsub.s32 2, %v411_v40 }
  0xa5   : > { %v1168_v57 = vpack.c.bf16 %v306_v49, %v294_v47  ;;  %v1170_v58 = vpack.c.bf16 %v331_v54, %v319_v53  ;;  %v406_v42 = vld [vmem:[#allocation7] sm:$0xff] }
  0xa6   : > { %1117 = vmatpush1.bf16.msra.mxu0 %v1116_v59  ;;  %v318_v59 = vld [vmem:[#allocation5 + $0x340] sm:$0xff]  ;;  %v421_v47 = vrot.slane %v406_v42, %v420_v43 }
  0xa7   : > { %1149 = vmatpush1.bf16.msra.mxu1 %v1148_v60  ;;  %1119 = vmatprep.subr.bf16.mxu0 %v1118_v61  ;;  %v330_v60 = vld [vmem:[#allocation5 + $0x3a0] sm:$0xff]  ;;  %v320_v61 = vld [vmem:[#allocation5 + $0x350] sm:$0xff] }
  0xa8   : > { %1151 = vmatprep.subr.bf16.mxu1 %v1150_v2  ;;  %v355_v2 = vld [vmem:[#allocation5 + $0x468] sm:$0xff]  ;;  %v1172_v5 = vpack.c.bf16 %v330_v60, %v318_v59  ;;  %v1204_v6 = vpack.c.bf16 %v332_v63, %v320_v61  ;;  %v432_v59 = vsub.s32 5, %v411_v40  ;;  %v440_v60 = vsub.s32 7, %v411_v40 }
  0xa9   : > { %v1174_v7 = vpack.c.bf16 %v355_v2, %v343_v1 }
  0xaa   : > { %1121 = vmatpush1.bf16.msra.mxu0 %v1120_v8  ;;  %v342_v8 = vld [vmem:[#allocation5 + $0x400] sm:$0xff]  ;;  %v433_v63 = vrot.slane %v406_v42, %v432_v59  ;;  %v441_v1 = vrot.slane %v406_v42, %v440_v60 }
  0xab   : > { %1153 = vmatpush1.bf16.msra.mxu1 %v1152_v9  ;;  %1155 = vmatprep.subr.bf16.mxu0 %v1154_v10  ;;  %v354_v9 = vld [vmem:[#allocation5 + $0x460] sm:$0xff]  ;;  %v344_v10 = vld [vmem:[#allocation5 + $0x410] sm:$0xff] }
  0xac   : > { %1187 = vmatprep.subr.bf16.mxu1 %v1186_v14  ;;  %v379_v14 = vld [vmem:[#allocation5 + $0x528] sm:$0xff]  ;;  %v1176_v17 = vpack.c.bf16 %v354_v9, %v342_v8  ;;  %v1208_v18 = vpack.c.bf16 %v356_v12, %v344_v10 }
  0xad   : > { %677 = vmatmul.mubr.f32.vlgmr.msra.gmra.mrb[2].mxu0 %v1661_v48  ;;  %v1178_v19 = vpack.c.bf16 %v379_v14, %v367_v13  ;;  %v407_v10 = vld [vmem:[#allocation7 + $0x8] sm:$0xf] }
  0xae   : > { %748 = vmatmul.mubr.f32.vlgmr.msra.gmra.mrb[2].mxu1 %v1661_v48  ;;  %1157 = vmatpush1.bf16.msra.mxu0 %v1156_v20  ;;  %v366_v20 = vld [vmem:[#allocation5 + $0x4c0] sm:$0xff]  ;;  %v453_v12 = vrot.slane %v407_v10, %v420_v43 }
  0xaf   : > { %1189 = vmatpush1.bf16.msra.mxu1 %v1188_v21  ;;  %1159 = vmatprep.subr.bf16.mxu0 %v1158_v22  ;;  %v378_v21 = vld [vmem:[#allocation5 + $0x520] sm:$0xff]  ;;  %v368_v22 = vld [vmem:[#allocation5 + $0x4d0] sm:$0xff] }
  0xb0   : > { %1191 = vmatprep.subr.bf16.mxu1 %v1190_v26  ;;  %818 = vmatprep.mubr.f32.mxu0 %v1453_v0  ;;  %v403_v26 = vld [vmem:[#allocation5 + $0x5e8] sm:$0xff]  ;;  %v1180_v29 = vpack.c.bf16 %v378_v21, %v366_v20  ;;  %v1212_v30 = vpack.c.bf16 %v380_v24, %v368_v22 }
  0xb1   : > { %889 = vmatprep.mubr.f32.mxu1 %v1453_v0  ;;  %v1200_v0 = vpack.c.bf16 %v308_v52, %v296_v50  ;;  %v1182_v31 = vpack.c.bf16 %v403_v26, %v391_v25 }
  0xb2   : > { %1161 = vmatpush1.bf16.msra.mxu0 %v1160_v32  ;;  %v390_v32 = vld [vmem:[#allocation5 + $0x580] sm:$0xff] }
  0xb3   : > { %1193 = vmatpush1.bf16.msra.mxu1 %v1192_v33  ;;  %1163 = vmatprep.subr.bf16.mxu0 %v1162_v34  ;;  %v402_v33 = vld [vmem:[#allocation5 + $0x5e0] sm:$0xff]  ;;  %v1214_v34 = vpack.c.bf16 %v405_v28, %v393_v27 }
  0xb4   : > { %1195 = vmatprep.subr.bf16.mxu1 %v1194_v38  ;;  %v1184_v37 = vpack.c.bf16 %v402_v33, %v390_v32  ;;  %v1216_v38 = vpack.c.bf16 %v404_v36, %v392_v35 }
  0xb6   : > { %1165 = vmatpush1.bf16.msra.mxu0 %v1164_v44  ;;  %v416_v44 = vsub.s32 1, %v411_v40 }
  0xb7   : > { %1197 = vmatpush1.bf16.msra.mxu1 %v1196_v45  ;;  %1167 = vmatprep.subr.bf16.mxu0 %v1166_v46  ;;  %v424_v45 = vsub.s32 3, %v411_v40  ;;  %v413_v46 = vrot.slane %v406_v42, %v412_v41 }
  0xb8   : > { %1199 = vmatprep.subr.bf16.mxu1 %v1198_v51  ;;  %v417_v49 = vrot.slane %v406_v42, %v416_v44  ;;  %v449_v13 = vrot.slane %v407_v10, %v416_v44 }
  0xb9   : > { %v425_v50 = vrot.slane %v406_v42, %v424_v45  ;;  %v457_v14 = vrot.slane %v407_v10, %v424_v45 }
  0xba   : > { %1169 = vmatpush1.bf16.msra.mxu0 %v1168_v57 }
  0xbb   : > { %1201 = vmatpush1.bf16.msra.mxu1 %v1200_v0  ;;  %1171 = vmatprep.subr.bf16.mxu0 %v1170_v58  ;;  %v428_v0 = vsub.s32 4, %v411_v40  ;;  %v436_v58 = vsub.s32 6, %v411_v40 }
  0xbc   : > { %1203 = vmatprep.subr.bf16.mxu1 %v1202_v62 }
  0xbd   : > { %v429_v61 = vrot.slane %v406_v42, %v428_v0  ;;  %v437_v62 = vrot.slane %v406_v42, %v436_v58 }
  0xbe   : > { %1173 = vmatpush1.bf16.msra.mxu0 %v1172_v5 }
  0xbf   : > { %1205 = vmatpush1.bf16.msra.mxu1 %v1204_v6  ;;  %1175 = vmatprep.subr.bf16.mxu0 %v1174_v7 }
  0xc0   : > { %1207 = vmatprep.subr.bf16.mxu1 %v1206_v11  ;;  %v445_v11 = vrot.slane %v407_v10, %v412_v41 }
  0xc2   : > { %1177 = vmatpush1.bf16.msra.mxu0 %v1176_v17 }
  0xc3   : > { %1209 = vmatpush1.bf16.msra.mxu1 %v1208_v18  ;;  %1179 = vmatprep.subr.bf16.mxu0 %v1178_v19 }
  0xc4   : > { %1211 = vmatprep.subr.bf16.mxu1 %v1210_v23 }
  0xc6   : > { %1181 = vmatpush1.bf16.msra.mxu0 %v1180_v29 }
  0xc7   : > { %1213 = vmatpush1.bf16.msra.mxu1 %v1212_v30  ;;  %1183 = vmatprep.subr.bf16.mxu0 %v1182_v31 }
  0xc8   : > { %1215 = vmatprep.subr.bf16.mxu1 %v1214_v34 }
  0xca   : > { %1185 = vmatpush1.bf16.msra.mxu0 %v1184_v37 }
  0xcb   : > { %1217 = vmatpush1.bf16.msra.mxu1 %v1216_v38 }
  0xcd   : > { %819 = vmatmul.mubr.f32.vlgmr.msra.gmra.mrb[4].mxu0 %v1661_v48 }
  0xce   : > { %890 = vmatmul.mubr.f32.vlgmr.msra.gmra.mrb[4].mxu1 %v1661_v48 }
 0x160   : > { %v536_v51 = vpop.f32.mrb[0].mxu0 }
 0x161   : > { %v537_v52 = vadd.f32 %v536_v51, %v413_v46  ;;  %v607_v53 = vpop.f32.mrb[0].mxu1  ;;  %v538_v54 = vpop.f32.mrb[1].mxu0 }
 0x162   : > { %v608_v55 = vadd.f32 %v607_v53, %v421_v47  ;;  %v539_v56 = vadd.f32 %v538_v54, %v417_v49  ;;  %v609_v57 = vpop.f32.mrb[1].mxu1 }
 0x163   : > { %896 = vst [vmem:[%s1674_s20] sm:$0xff] %v537_v52  ;;  %v610_v48 = vadd.f32 %v609_v57, %v425_v50 }
 0x164   : > { %898 = vst [vmem:[%s1674_s20 + $0x10] sm:$0xff] %v608_v55  ;;  %897 = vst [vmem:[%s1674_s20 + $0x8] sm:$0xff] %v539_v56 }
 0x165   : > { %899 = vst [vmem:[%s1674_s20 + $0x18] sm:$0xff] %v610_v48 }
 0x180   : > { %v678_v2 = vpop.f32.mrb[2].mxu0 }
 0x181   : > { %v679_v3 = vadd.f32 %v678_v2, %v429_v61  ;;  %v749_v4 = vpop.f32.mrb[2].mxu1  ;;  %v680_v5 = vpop.f32.mrb[3].mxu0 }
 0x182   : > { %v750_v6 = vadd.f32 %v749_v4, %v437_v62  ;;  %v681_v7 = vadd.f32 %v680_v5, %v433_v63  ;;  %v751_v8 = vpop.f32.mrb[3].mxu1 }
 0x183   : > { %900 = vst [vmem:[%s1674_s20 + $0x20] sm:$0xff] %v679_v3  ;;  %v752_v9 = vadd.f32 %v751_v8, %v441_v1 }
 0x184   : > { %902 = vst [vmem:[%s1674_s20 + $0x30] sm:$0xff] %v750_v6  ;;  %901 = vst [vmem:[%s1674_s20 + $0x28] sm:$0xff] %v681_v7 }
 0x185   : > { %903 = vst [vmem:[%s1674_s20 + $0x38] sm:$0xff] %v752_v9 }
 0x1a0   : > { %v820_v15 = vpop.f32.mrb[4].mxu0 }
 0x1a1   : > { %v821_v16 = vadd.f32 %v820_v15, %v445_v11  ;;  %v891_v17 = vpop.f32.mrb[4].mxu1  ;;  %v822_v18 = vpop.f32.mrb[5].mxu0 }
 0x1a2   : > { %v892_v19 = vadd.f32 %v891_v17, %v453_v12  ;;  %v823_v20 = vadd.f32 %v822_v18, %v449_v13  ;;  %v893_v21 = vpop.f32.mrb[5].mxu1 }
 0x1a3   : > { %904 = vst [vmem:[%s1674_s20 + $0x40] sm:$0xff] %v821_v16  ;;  %v894_v22 = vadd.f32 %v893_v21, %v457_v14 }
 0x1a4   : > { %906 = vst [vmem:[%s1674_s20 + $0x50] sm:$0xff] %v892_v19  ;;  %905 = vst [vmem:[%s1674_s20 + $0x48] sm:$0xff] %v823_v20 }
 0x1a5   : > { %907 = vst [vmem:[%s1674_s20 + $0x58] sm:$0xff] %v894_v22 }
 0x1a6   : > { %1389 = shalt.err (!%p1386_p2)
}
 0x1a7   : > { %s1390_s9 = scalar_lea.hbm %s1690_s29, 1536  ;;  %s1394_s11 = scalar_lea.hbm %s1740_s3, 3072 }
 0x1a8   : > { %p1391_p13 = scmp.ne.s32.totalorder %s1690_s29, %s1390_s9  ;;  %p1395_p4 = scmp.lt.u32.totalorder %s1690_s29, %s1740_s3 }
 0x1a9   : > { %p1396_p5 = scmp.lt.u32.totalorder %s1394_s11, %s1390_s9  ;;  %p1398_p11 = scmp.lt.u32.totalorder %s1390_s9, %s1690_s29 }
 0x1aa   : > { %p1392_p6 = pnand %p1391_p13, %p1754_p0 }
 0x1ab   : > { %p1397_p8 = por %p1396_p5, %p1395_p4 }
 0x1ac   : > { %p1393_p10 = pneg %p1392_p6 }
 0x1ad   : > { %p1399_p1 = por %p1398_p11, %p1397_p8 }
 0x1af   : > { %p1400_p3 = pnand %p1399_p1, %p1393_p10 }
 0x1b1   : > { %1403 = shalt.err (!%p1400_p3)
}
 0x1b2   : > { %1230 = dma.vmem_to_hbm [thread:$0]  (%p1754_p0), %s1692_s24, 1536, %s1690_s29, %s909_s16  }
 0x1b3 PF: > { %s935_s22 = sand.u32 1, %s1434_s12   ;;  %p1755_p7 = scmp.ne.s32.totalorder %s1745_s19, 0 }
 0x1b4   : > { %p1756_p9 = scmp.ge.s32.totalorder %s1446_s15, 2  ;;  %s936_s18 = scalar_lea.sflag [#allocation4], %s935_s22 }
 0x1b6   : > { %p1244_p12 = pnand %p1756_p9, %p1755_p7 }
 0x1b8   : > { %1429 = dma.done.wait (!%p1244_p12), %s936_s18, 1536  }
 0x1b9   : > { %1431 = vsyncadd (!%p1244_p12), %s936_s18, 4294965760  ;;  %p17_p2 = scmp.ge.s32.totalorder %s1585_s4, 4   ;;  %s1757_s12 = smov %s1438_s13 }
 0x1ba   : > { %s1758_s13 = smov %s1442_s14  ;;  %s1759_s14 = smov %s1601_s7 }
 0x1bb   : > { %s1760_s15 = smov %s1585_s4  ;;  %19 = sbr.rel (!%p17_p2) target bundleno = 6 (0x6), region = 85 }
 0x1c2   :  { %941 = vsyncpa [#allocation3], 1 }
 0x1c3   :  { %943 = vsyncpa [#allocation3 + $0x1], 1 }
 0x1c4   :  { %944 = vsyncpa [#allocation6], 1 }
 0x1c5   :  { %945 = vsyncpa [#allocation4], 1 }
 0x1c6   :  { %947 = vsyncpa [#allocation4 + $0x1], 1 }

</bundles_post_ra>
